<compile_context>
chip_gen: v7x
topology: tpu7x:2x2x1
jax: 0.10.0
libtpu: 0.0.40
codegen_flags: <defaults>
</compile_context>

<pallas_src>
import functools

import jax
import jax.numpy as jnp
from jax.experimental import pallas as pl
from jax.experimental.pallas import tpu as pltpu


def _round_up(x, m):
    return (x + m - 1) // m * m


# --------------------------------------------------------------------------
# Tile pickers
# --------------------------------------------------------------------------
def _pick_m_tile(m):
    mp = _round_up(m, 8)
    for t in (512, 448, 384, 320, 256, 192, 128):
        if mp % t == 0:
            return t, mp
    if mp <= 512:
        return mp, mp
    return 256, _round_up(mp, 256)


def _pick_k_tile(k):
    if k % 128 != 0:
        return k                      # full-extent K block (147 / 64), no padding
    for t in (512, 384, 256, 128):
        if k % t == 0:
            return t
    return 128


def _pick_n_tile(n):
    if n % 128 != 0:
        return n                      # full-extent N block (64), no padding
    for t in (512, 384, 256, 128):
        if n % t == 0:
            return t
    return 128


# --------------------------------------------------------------------------
# Fused matmul kernel: (A @ B) * scale + bias [+ residual] [+ ReLU]
# A/B bf16 on the MXU, f32 accumulation, f32 epilogue.
# --------------------------------------------------------------------------
def _fused_matmul_kernel(*refs, relu, has_residual):
    if has_residual:
        a_ref, b_ref, s_ref, bi_ref, r_ref, o_ref, acc_ref = refs
    else:
        a_ref, b_ref, s_ref, bi_ref, o_ref, acc_ref = refs

    @pl.when(pl.program_id(2) == 0)
    def _():
        acc_ref[...] = jnp.zeros_like(acc_ref)

    acc_ref[...] += jnp.dot(a_ref[...], b_ref[...],
                            preferred_element_type=jnp.float32)

    @pl.when(pl.program_id(2) == pl.num_programs(2) - 1)
    def _():
        y = acc_ref[...] * s_ref[...] + bi_ref[...]
        if has_residual:
            y = y + r_ref[...].astype(jnp.float32)
        if relu:
            y = jnp.maximum(y, 0.0)
        o_ref[...] = y.astype(o_ref.dtype)


def fused_matmul(a, b, scale, bias, residual=None, relu=False,
                 out_dtype=jnp.bfloat16):
    """a: [M, K]; b: [K, N] bf16 (pre-laid-out); scale/bias: [1, N] f32."""
    M, K = a.shape
    K2, N = b.shape
    assert K == K2 and scale.shape == (1, N) and bias.shape == (1, N)
    tm, Mp = _pick_m_tile(M)
    tk = _pick_k_tile(K)
    tn = _pick_n_tile(N)

    a = a.astype(jnp.bfloat16)
    if Mp != M:
        a = jnp.pad(a, ((0, Mp - M), (0, 0)))

    in_arrays = [a, b, scale, bias]
    in_specs = [
        pl.BlockSpec((tm, tk), lambda i, j, k: (i, k)),
        pl.BlockSpec((tk, tn), lambda i, j, k: (k, j)),
        pl.BlockSpec((1, tn), lambda i, j, k: (0, j)),
        pl.BlockSpec((1, tn), lambda i, j, k: (0, j)),
    ]
    has_residual = residual is not None
    if has_residual:
        r = residual.astype(jnp.bfloat16)
        if Mp != M:
            r = jnp.pad(r, ((0, Mp - M), (0, 0)))
        in_arrays.append(r)
        in_specs.append(pl.BlockSpec((tm, tn), lambda i, j, k: (i, j)))

    out = pl.pallas_call(
        functools.partial(_fused_matmul_kernel, relu=relu,
                          has_residual=has_residual),
        out_shape=jax.ShapeDtypeStruct((Mp, N), out_dtype),
        grid_spec=pltpu.PrefetchScalarGridSpec(
            num_scalar_prefetch=0,
            grid=(Mp // tm, N // tn, K // tk),
            in_specs=in_specs,
            out_specs=pl.BlockSpec((tm, tn), lambda i, j, k: (i, j)),
            scratch_shapes=[pltpu.VMEM((tm, tn), jnp.float32)],
        ),
        compiler_params=pltpu.CompilerParams(
            dimension_semantics=("parallel", "parallel", "arbitrary")),
    )(*in_arrays)
    if Mp != M:
        out = out[:M]
    return out


# --------------------------------------------------------------------------
# Halo 3x3 / stride-1 conv kernel: no im2col.  Each grid step reads th+2
# padded input rows via BlockSpec index_maps and accumulates the 9 taps
# in-kernel; BN scale/bias + ReLU fused in the epilogue.
# --------------------------------------------------------------------------
def _conv3x3_kernel(*refs, th, wo, relu):
    row_refs = refs[:th + 2]
    w_ref, s_ref, b_ref, o_ref = refs[th + 2:]
    rows = [r[0, 0] for r in row_refs]                  # each (Wp, Cin) bf16
    tn = o_ref.shape[-1]
    cin = rows[0].shape[-1]
    m = th * wo
    mp = _round_up(m, 8)                                # keep MXU M >= 8
    acc = jnp.zeros((mp, tn), jnp.float32)
    for ki in range(3):
        for kj in range(3):
            pieces = [rows[q + ki][kj:kj + wo, :] for q in range(th)]
            if mp != m:
                pieces.append(jnp.zeros((mp - m, cin), rows[0].dtype))
            a = jnp.concatenate(pieces, axis=0)         # (mp, Cin)
            acc = acc + jnp.dot(a, w_ref[ki, kj],
                                preferred_element_type=jnp.float32)
    y = acc * s_ref[...] + b_ref[...]
    if relu:
        y = jnp.maximum(y, 0.0)
    y = y.astype(o_ref.dtype)
    for q in range(th):
        o_ref[q] = y[q * wo:(q + 1) * wo, :]


def conv3x3_s1(x, w4, scale, bias, relu=True):
    """3x3 / stride 1 / pad 1 conv + folded BN (+ReLU).
    x: [N,H,W,Cin] bf16; w4: [3,3,Cin,Cout] bf16; scale/bias: [1,Cout] f32."""
    N, H, W, Cin = x.shape
    Cout = w4.shape[-1]
    Ho, Wo = H, W
    xp = jnp.pad(x, ((0, 0), (1, 1), (1, 1), (0, 0)))
    Wp = W + 2
    th = 1
    for t in (8, 7, 6, 5, 4, 3, 2, 1):
        if Ho % t == 0:
            th = t
            break
    tn = Cout                               # Cout <= 512 for all 3x3 convs
    n_rows = th + 2

    def _row_spec(r):
        return pl.BlockSpec((1, 1, Wp, Cin),
                            lambda n, hb, j, r=r: (n, hb * th + r, 0, 0))

    in_specs = [_row_spec(r) for r in range(n_rows)]
    in_specs += [
        pl.BlockSpec((3, 3, Cin, tn), lambda n, hb, j: (0, 0, 0, j)),
        pl.BlockSpec((1, tn), lambda n, hb, j: (0, j)),
        pl.BlockSpec((1, tn), lambda n, hb, j: (0, j)),
    ]
    out = pl.pallas_call(
        functools.partial(_conv3x3_kernel, th=th, wo=Wo, relu=relu),
        out_shape=jax.ShapeDtypeStruct((N * Ho, Wo, Cout), jnp.bfloat16),
        grid=(N, Ho // th, Cout // tn),
        in_specs=in_specs,
        out_specs=pl.BlockSpec((th, Wo, tn),
                               lambda n, hb, j: (n * (Ho // th) + hb, 0, j)),
        compiler_params=pltpu.CompilerParams(
            dimension_semantics=("parallel", "parallel", "parallel")),
    )(*([xp] * n_rows), w4, scale, bias)
    return out.reshape(N, Ho, Wo, Cout)


# --------------------------------------------------------------------------
# MaxPool 3x3 / stride 2 / pad 1
# --------------------------------------------------------------------------
def _maxpool_h_kernel(x0_ref, x1_ref, x2_ref, o_ref):
    o_ref[...] = jnp.maximum(jnp.maximum(x0_ref[...], x1_ref[...]),
                             x2_ref[...])


def maxpool_3x3_s2(x):
    """PyTorch MaxPool2d(kernel=3, stride=2, padding=1) on NHWC."""
    N, H, W, C = x.shape
    Ho = (H - 1) // 2 + 1
    Wo = (W - 1) // 2 + 1
    neg = float(jnp.finfo(x.dtype).min)
    xp = jnp.pad(x, ((0, 0), (1, 1), (1, 1), (0, 0)), constant_values=neg)
    # W-direction 3-tap / stride-2 max fused by XLA (one pass over xp).
    wmax = jnp.maximum(
        jnp.maximum(xp[:, :, 0:2 * Wo:2, :], xp[:, :, 1:1 + 2 * Wo:2, :]),
        xp[:, :, 2:2 + 2 * Wo:2, :])                    # [N, H+2, Wo, C]
    # H-direction 3-tap / stride-2 max: taps come from three index_maps,
    # nothing extra materialized and no C padding (full-dim blocks).
    def _tap_spec(r):
        return pl.BlockSpec((1, 1, Wo, C),
                            lambda n, ho, r=r: (n, 2 * ho + r, 0, 0))

    out = pl.pallas_call(
        _maxpool_h_kernel,
        out_shape=jax.ShapeDtypeStruct((N, Ho, Wo, C), x.dtype),
        grid=(N, Ho),
        in_specs=[_tap_spec(0), _tap_spec(1), _tap_spec(2)],
        out_specs=pl.BlockSpec((1, 1, Wo, C), lambda n, ho: (n, ho, 0, 0)),
        compiler_params=pltpu.CompilerParams(
            dimension_semantics=("parallel", "parallel")),
    )(wmax, wmax, wmax)
    return out


# --------------------------------------------------------------------------
# Global average pool (AdaptiveAvgPool2d((1,1))), gridded over the batch.
# --------------------------------------------------------------------------
def _gap_kernel(x_ref, o_ref, *, inv_hw):
    o_ref[...] = (jnp.sum(x_ref[...].astype(jnp.float32), axis=1,
                          keepdims=True) * inv_hw)


def global_avg_pool(x):
    N, H, W, C = x.shape
    HW = H * W
    x2 = x.reshape(N, HW, C)
    out = pl.pallas_call(
        functools.partial(_gap_kernel, inv_hw=1.0 / float(HW)),
        out_shape=jax.ShapeDtypeStruct((N, 1, C), jnp.float32),
        grid=(N,),
        in_specs=[pl.BlockSpec((1, HW, C), lambda n: (n, 0, 0))],
        out_specs=pl.BlockSpec((1, 1, C), lambda n: (n, 0, 0)),
        compiler_params=pltpu.CompilerParams(
            dimension_semantics=("parallel",)),
    )(x2)
    return out.reshape(N, C)


# --------------------------------------------------------------------------
# Conv glue
# --------------------------------------------------------------------------
def _im2col(x, kh, kw, stride, padding):
    N, H, W, C = x.shape
    if padding:
        x = jnp.pad(x, ((0, 0), (padding, padding), (padding, padding), (0, 0)))
    Ho = (H + 2 * padding - kh) // stride + 1
    Wo = (W + 2 * padding - kw) // stride + 1
    cols = []
    for i in range(kh):
        for j in range(kw):
            cols.append(x[:, i:i + stride * Ho:stride,
                          j:j + stride * Wo:stride, :])
    patches = jnp.concatenate(cols, axis=-1)            # [N, Ho, Wo, kh*kw*C]
    return patches.reshape(N * Ho * Wo, kh * kw * C), Ho, Wo


def conv_bn(x, w, bn, kh, kw, stride, padding, relu, residual=None):
    """Conv (no bias) + folded-BN scale/bias [+ residual] [+ ReLU]."""
    N, H, W, C = x.shape
    scale, bias = bn
    if kh == 3 and kw == 3 and stride == 1 and padding == 1:
        assert residual is None
        return conv3x3_s1(x, w, scale, bias, relu=relu)     # halo kernel, no im2col
    cout = w.shape[1]                                        # matmul layout [K, Cout]
    if kh == 1 and kw == 1 and padding == 0:
        # TODO(synk): stride-2 1x1 downsample still does a strided HBM
        # subsample of x before the matmul; could be folded into the grid.
        xs = x[:, ::stride, ::stride, :] if stride > 1 else x
        Ho, Wo = xs.shape[1], xs.shape[2]
        patches = xs.reshape(-1, C)
    else:
        # TODO(synk): the 7x7 stem conv and the three stride-2 3x3 convs still
        # materialize im2col patches in HBM (all other 3x3s use the halo kernel).
        patches, Ho, Wo = _im2col(x, kh, kw, stride, padding)
    res2d = residual.reshape(-1, cout) if residual is not None else None
    out = fused_matmul(patches, w, scale, bias,
                       residual=res2d, relu=relu, out_dtype=jnp.bfloat16)
    return out.reshape(N, Ho, Wo, cout)


# --------------------------------------------------------------------------
# ResNet-50 parameters (deterministic synthetic init) and forward
# --------------------------------------------------------------------------
LAYER_CFG = [(3, 64, 1), (4, 128, 2), (6, 256, 2), (3, 512, 2)]  # resnet50


def _conv_w_matmul(key, cout, cin, kh, kw):
    fan_in = cin * kh * kw
    std = (2.0 / fan_in) ** 0.5
    w = jax.random.normal(key, (cout, cin, kh, kw), jnp.float32) * std
    # PyTorch [Cout,Cin,KH,KW] -> matmul layout [KH*KW*Cin, Cout], bf16.
    return jnp.transpose(w, (2, 3, 1, 0)).reshape(kh * kw * cin, cout).astype(
        jnp.bfloat16)


def _conv_w_3x3(key, cout, cin):
    std = (2.0 / (cin * 9)) ** 0.5
    w = jax.random.normal(key, (cout, cin, 3, 3), jnp.float32) * std
    # [Cout,Cin,3,3] -> [3,3,Cin,Cout] bf16 for the halo kernel.
    return jnp.transpose(w, (2, 3, 1, 0)).astype(jnp.bfloat16)


def _init_bn(key, c):
    k1, k2 = jax.random.split(key)
    gamma = jax.random.uniform(k1, (c,), jnp.float32, 0.5, 1.0)
    beta = jax.random.normal(k2, (c,), jnp.float32) * 0.1
    running_mean = jnp.zeros((c,), jnp.float32)
    running_var = jnp.ones((c,), jnp.float32)
    eps = 1e-5
    scale = gamma / jnp.sqrt(running_var + eps)          # folded, f32
    bias = beta - running_mean * scale
    return (scale.reshape(1, c), bias.reshape(1, c))


def make_resnet50_params(key, num_classes):
    keys = iter(jax.random.split(key, 512))
    params = {
        "conv1": _conv_w_matmul(next(keys), 64, 3, 7, 7),
        "bn1": _init_bn(next(keys), 64),
    }
    layers = []
    in_ch = 64
    for (nblocks, width, stride) in LAYER_CFG:
        out_ch = width * 4
        blocks = []
        for b in range(nblocks):
            s = stride if b == 0 else 1
            if s == 1:
                conv2_w = _conv_w_3x3(next(keys), width, width)
            else:
                conv2_w = _conv_w_matmul(next(keys), width, width, 3, 3)
            blk = {
                "conv1": _conv_w_matmul(next(keys), width, in_ch, 1, 1),
                "bn1": _init_bn(next(keys), width),
                "conv2": conv2_w,
                "bn2": _init_bn(next(keys), width),
                "conv3": _conv_w_matmul(next(keys), out_ch, width, 1, 1),
                "bn3": _init_bn(next(keys), out_ch),
            }
            if s != 1 or in_ch != out_ch:
                blk["down_conv"] = _conv_w_matmul(next(keys), out_ch, in_ch, 1, 1)
                blk["down_bn"] = _init_bn(next(keys), out_ch)
            blocks.append(blk)
            in_ch = out_ch
        layers.append(blocks)
    params["layers"] = layers
    # fc pre-transposed + lane-padded at init: [2048, round_up(nc,128)] bf16.
    ncp = _round_up(num_classes, 128)
    fc_w = (jax.random.normal(next(keys), (num_classes, 2048), jnp.float32)
            * (1.0 / 2048 ** 0.5))
    fc_w = jnp.pad(fc_w, ((0, ncp - num_classes), (0, 0)))
    params["fc_w"] = fc_w.T.astype(jnp.bfloat16)
    params["fc_b"] = jnp.zeros((1, ncp), jnp.float32)
    params["fc_scale"] = jnp.ones((1, ncp), jnp.float32)
    return params


def bottleneck_forward(x, blk, stride):
    if "down_conv" in blk:
        identity = conv_bn(x, blk["down_conv"], blk["down_bn"],
                           1, 1, stride, 0, relu=False)
    else:
        identity = x
    out = conv_bn(x, blk["conv1"], blk["bn1"], 1, 1, 1, 0, relu=True)
    out = conv_bn(out, blk["conv2"], blk["bn2"], 3, 3, stride, 1, relu=True)
    # conv3 + BN3 + residual add + ReLU fused into one matmul epilogue.
    out = conv_bn(out, blk["conv3"], blk["bn3"], 1, 1, 1, 0,
                  relu=True, residual=identity)
    return out


def resnet_finetune_forward(params, x_nchw, num_classes):
    """ResNetFinetune.forward: resnet50 backbone + Linear(2048, num_classes)."""
    x = jnp.transpose(x_nchw, (0, 2, 3, 1)).astype(jnp.bfloat16)  # NCHW -> NHWC
    x = conv_bn(x, params["conv1"], params["bn1"], 7, 7, 2, 3, relu=True)
    x = maxpool_3x3_s2(x)
    for (nblocks, width, stride), blocks in zip(LAYER_CFG, params["layers"]):
        for b, blk in enumerate(blocks):
            s = stride if b == 0 else 1
            x = bottleneck_forward(x, blk, s)
    pooled = global_avg_pool(x)                          # [N, 2048] f32
    logits = fused_matmul(pooled, params["fc_w"], params["fc_scale"],
                          params["fc_b"], relu=False, out_dtype=jnp.float32)
    return logits[:, :num_classes]                       # [N, num_classes] f32


# --------------------------------------------------------------------------
# Small numeric self-checks (kernel vs XLA reference) + end-to-end run
# --------------------------------------------------------------------------
def _self_checks(key):
    k1, k2, k3, k4 = jax.random.split(key, 4)
    # fused matmul
    a = jax.random.normal(k1, (128, 256), jnp.float32).astype(jnp.bfloat16)
    b = jax.random.normal(k2, (256, 384), jnp.float32).astype(jnp.bfloat16)
    s = jnp.ones((1, 384), jnp.float32) * 0.5
    c = jnp.ones((1, 384), jnp.float32) * 0.1
    got = fused_matmul(a, b, s, c, relu=True, out_dtype=jnp.float32)
    ref = jnp.maximum(
        jnp.dot(a.astype(jnp.float32), b.astype(jnp.float32)) * s + c, 0.0)
    assert float(jnp.max(jnp.abs(got - ref))) < 0.1
    # halo 3x3 conv
    x = jax.random.normal(k3, (2, 16, 16, 64), jnp.float32).astype(jnp.bfloat16)
    w = (jax.random.normal(k4, (3, 3, 64, 64), jnp.float32) * 0.06).astype(
        jnp.bfloat16)
    ones = jnp.ones((1, 64), jnp.float32)
    zeros = jnp.zeros((1, 64), jnp.float32)
    got = conv3x3_s1(x, w, ones, zeros, relu=False).astype(jnp.float32)
    ref = jax.lax.conv_general_dilated(
        x, w, window_strides=(1, 1), padding=((1, 1), (1, 1)),
        dimension_numbers=("NHWC", "HWIO", "NHWC"),
        preferred_element_type=jnp.float32)
    assert float(jnp.max(jnp.abs(got - ref))) < 0.1


if __name__ == "__main__":
    num_classes = 10
    key = jax.random.PRNGKey(0)
    k_params, k_x, k_chk = jax.random.split(key, 3)

    _self_checks(k_chk)

    params = make_resnet50_params(k_params, num_classes)
    x = jax.random.normal(k_x, (2, 3, 64, 64), jnp.float32)  # small NCHW input

    fwd = jax.jit(lambda p, inp: resnet_finetune_forward(p, inp, num_classes))
    logits = fwd(params, x)
    jax.block_until_ready(logits)
    assert logits.shape == (2, num_classes)
    assert bool(jnp.all(jnp.isfinite(logits)))
    print("KERNEL_OK")
</pallas_src>

<mosaic_0001>
module attributes {stable_mosaic.version = 11 : i64} {
  func.func @_fused_matmul_kernel(%arg0: i32, %arg1: i32, %arg2: i32, %arg3: memref<128x256xbf16, #tpu.memory_space<vmem>>, %arg4: memref<256x384xbf16, #tpu.memory_space<vmem>>, %arg5: memref<1x384xf32, #tpu.memory_space<vmem>>, %arg6: memref<1x384xf32, #tpu.memory_space<vmem>>, %arg7: memref<128x384xf32, #tpu.memory_space<vmem>>, %arg8: memref<128x384xf32, #tpu.memory_space<vmem>>) attributes {dimension_semantics = [#tpu.dimension_semantics<parallel>, #tpu.dimension_semantics<parallel>, #tpu.dimension_semantics<arbitrary>], iteration_bounds = array<i64: 1, 1, 1>, scalar_prefetch = 0 : i64, scratch_operands = 1 : i64, tpu.core_type = #tpu.core_type<tc>, window_params = [{transform_indices = @transform_0, window_bounds = array<i64: 128, 256>}, {transform_indices = @transform_1, window_bounds = array<i64: 256, 384>}, {transform_indices = @transform_2, window_bounds = array<i64: 1, 384>}, {transform_indices = @transform_3, window_bounds = array<i64: 1, 384>}, {transform_indices = @transform_4, window_bounds = array<i64: 128, 384>}]} {
    %c0_i32 = arith.constant 0 : i32
    %0 = arith.cmpi eq, %arg2, %c0_i32 : i32
    %1 = arith.extui %0 : i1 to i32
    %c0_i32_0 = arith.constant 0 : i32
    %2 = arith.cmpi ne, %1, %c0_i32_0 : i32
    scf.if %2 {
      %cst_10 = arith.constant 0.000000e+00 : f32
      %12 = vector.broadcast %cst_10 : f32 to vector<128x384xf32>
      %c0_11 = arith.constant 0 : index
      %c0_12 = arith.constant 0 : index
      %13 = vector.load %arg8[%c0_11, %c0_12] : memref<128x384xf32, #tpu.memory_space<vmem>>, vector<128x384xf32>
      tpu.vector_store %arg8[%c0_11, %c0_12], %12 {strides = array<i32>} : memref<128x384xf32, #tpu.memory_space<vmem>>, vector<128x384xf32>,
    } else {
    }
    %c0 = arith.constant 0 : index
    %c0_1 = arith.constant 0 : index
    %3 = vector.load %arg8[%c0, %c0_1] : memref<128x384xf32, #tpu.memory_space<vmem>>, vector<128x384xf32>
    %c0_2 = arith.constant 0 : index
    %c0_3 = arith.constant 0 : index
    %4 = vector.load %arg3[%c0_2, %c0_3] : memref<128x256xbf16, #tpu.memory_space<vmem>>, vector<128x256xbf16>
    %c0_4 = arith.constant 0 : index
    %c0_5 = arith.constant 0 : index
    %5 = vector.load %arg4[%c0_4, %c0_5] : memref<256x384xbf16, #tpu.memory_space<vmem>>, vector<256x384xbf16>
    %cst = arith.constant dense<0.000000e+00> : vector<128x384xf32>
    %6 = tpu.matmul %4, %5, %cst {dimension_numbers = #tpu.dot_dimension_numbers<[1], [0], [0], [1], [0, 0, 1, 1], [], []>} : vector<128x256xbf16>, vector<256x384xbf16>, vector<128x384xf32> -> vector<128x384xf32>
    %7 = arith.addf %3, %6 : vector<128x384xf32>
    %c0_6 = arith.constant 0 : index
    %c0_7 = arith.constant 0 : index
    %8 = vector.load %arg8[%c0_6, %c0_7] : memref<128x384xf32, #tpu.memory_space<vmem>>, vector<128x384xf32>
    tpu.vector_store %arg8[%c0_6, %c0_7], %7 {strides = array<i32>} : memref<128x384xf32, #tpu.memory_space<vmem>>, vector<128x384xf32>,
    %c0_i32_8 = arith.constant 0 : i32
    %9 = arith.cmpi eq, %arg2, %c0_i32_8 : i32
    %10 = arith.extui %9 : i1 to i32
    %c0_i32_9 = arith.constant 0 : i32
    %11 = arith.cmpi ne, %10, %c0_i32_9 : i32
    scf.if %11 {
      %c0_10 = arith.constant 0 : index
      %c0_11 = arith.constant 0 : index
      %12 = vector.load %arg8[%c0_10, %c0_11] : memref<128x384xf32, #tpu.memory_space<vmem>>, vector<128x384xf32>
      %c0_12 = arith.constant 0 : index
      %c0_13 = arith.constant 0 : index
      %13 = vector.load %arg5[%c0_12, %c0_13] : memref<1x384xf32, #tpu.memory_space<vmem>>, vector<1x384xf32>
      %14 = vector.broadcast %13 : vector<1x384xf32> to vector<128x384xf32>
      %15 = arith.mulf %12, %14 : vector<128x384xf32>
      %c0_14 = arith.constant 0 : index
      %c0_15 = arith.constant 0 : index
      %16 = vector.load %arg6[%c0_14, %c0_15] : memref<1x384xf32, #tpu.memory_space<vmem>>, vector<1x384xf32>
      %17 = vector.broadcast %16 : vector<1x384xf32> to vector<128x384xf32>
      %18 = arith.addf %15, %17 : vector<128x384xf32>
      %cst_16 = arith.constant 0.000000e+00 : f32
      %19 = vector.broadcast %cst_16 : f32 to vector<128x384xf32>
      %20 = arith.maximumf %18, %19 : vector<128x384xf32>
      %c0_17 = arith.constant 0 : index
      %c0_18 = arith.constant 0 : index
      %21 = vector.load %arg7[%c0_17, %c0_18] : memref<128x384xf32, #tpu.memory_space<vmem>>, vector<128x384xf32>
      tpu.vector_store %arg7[%c0_17, %c0_18], %20 {strides = array<i32>} : memref<128x384xf32, #tpu.memory_space<vmem>>, vector<128x384xf32>,
    } else {
    }
    return
  }
  func.func @transform_0(%arg0: i32, %arg1: i32, %arg2: i32) -> (i32, i32) {
    %c0_i32 = arith.constant 0 : i32
    return %arg0, %arg2 : i32, i32
  }
  func.func @transform_1(%arg0: i32, %arg1: i32, %arg2: i32) -> (i32, i32) {
    %c0_i32 = arith.constant 0 : i32
    return %arg2, %arg1 : i32, i32
  }
  func.func @transform_2(%arg0: i32, %arg1: i32, %arg2: i32) -> (i32, i32) {
    %c0_i32 = arith.constant 0 : i32
    %c0_i32_0 = arith.constant 0 : i32
    return %c0_i32, %arg1 : i32, i32
  }
  func.func @transform_3(%arg0: i32, %arg1: i32, %arg2: i32) -> (i32, i32) {
    %c0_i32 = arith.constant 0 : i32
    %c0_i32_0 = arith.constant 0 : i32
    return %c0_i32, %arg1 : i32, i32
  }
  func.func @transform_4(%arg0: i32, %arg1: i32, %arg2: i32) -> (i32, i32) {
    %c0_i32 = arith.constant 0 : i32
    return %arg0, %arg1 : i32, i32
  }
}

</mosaic_0001>

<bundles_post_ra>
// kernel: tpu_custom_call.1
= control target key start
LH: loop header
LB: loop body
LE: loop exit
PB: predicated region body
PF: predicated region fallthrough
CT: control target
= control target key end

     0   :  { %9 = vsyncpa [#allocation4], 0  ;;  %s1645_s0 = inlined_call_operand.hbm [shape: bf16[128,256], index: 0, kind: input, shape index: {}]   ;;  %s1646_s1 = inlined_call_operand.hbm [shape: bf16[256,384], index: 1, kind: input, shape index: {}]   ;;  %s1647_s2 = inlined_call_operand.vmem [shape: f32[1,384], index: 2, kind: input, shape index: {}]   ;;  %s1648_s3 = inlined_call_operand.vmem [shape: f32[1,384], index: 3, kind: input, shape index: {}]   ;;  %s1649_s4 = inlined_call_operand.hbm [shape: f32[128,384], index: 4, kind: output, shape index: {}]  }
   0x1   :  { %10 = vsyncpa [#allocation7], 0 }
   0x2   :  { %11 = vsyncpa [#allocation5], 0  ;;  %s1461_s15 = smov [#allocation3]   ;;  %s1389_s19 = scalar_lea.hbm %s1645_s0, 2048 }
   0x3   :  { %s17_s16 = sshll.u32 %s1461_s15, 4  ;;  %p1390_p0 = scmp.ne.s32.totalorder %s1645_s0, %s1389_s19  ;;  %s18_s16 = int_to_ptr.vmem [resolvable:$true] %s17_s16 }
   0x4   :  { %p1393_p1 = scmp.lt.u32.totalorder %s1389_s19, %s1645_s0 }
   0x6   :  { %p1395_p2 = pnand %p1393_p1, %p1390_p0 }
   0x8   :  { %1398 = shalt.err (!%p1395_p2)
}
   0x9   :  { %s1399_s24 = scalar_lea.vmem %s18_s16, 2048  ;;  %p1404_p4 = scmp.lt.s32.totalorder %s18_s16, %s18_s16 }
   0xa   :  { %p1400_p3 = scmp.ne.s32.totalorder %s18_s16, %s1399_s24  ;;  %p1405_p5 = scmp.lt.s32.totalorder %s1399_s24, %s1399_s24 }
   0xc   :  { %p1406_p6 = por %p1405_p5, %p1404_p4 }
   0xe   :  { %p1407_p7 = pnand %p1406_p6, %p1400_p3 }
  0x10   :  { %1410 = shalt.err (!%p1407_p7)
}
  0x11   :  { %s1462_s25 = smov 128   ;;  %s1463_s26 = smov 8  }
  0x12   :  { %23 = dma.hbm_to_vmem [thread:$0]  %s1645_s0, 2048, %s18_s16, [#allocation4], %s1462_s25, %s1462_s25, %s1463_s26  }
  0x13   :  { %s1464_s29 = smov [#allocation6]   ;;  %s1411_s7 = scalar_lea.hbm %s1646_s1, 6144 }
  0x14   :  { %s29_s30 = sshll.u32 %s1464_s29, 4  ;;  %p1412_p8 = scmp.ne.s32.totalorder %s1646_s1, %s1411_s7  ;;  %s30_s30 = int_to_ptr.vmem [resolvable:$true] %s29_s30 }
  0x15   :  { %p1415_p9 = scmp.lt.u32.totalorder %s1411_s7, %s1646_s1 }
  0x17   :  { %p1417_p10 = pnand %p1415_p9, %p1412_p8 }
  0x19   :  { %1420 = shalt.err (!%p1417_p10)
}
  0x1a   :  { %s1421_s12 = scalar_lea.vmem %s30_s30, 6144  ;;  %p1426_p12 = scmp.lt.s32.totalorder %s30_s30, %s30_s30 }
  0x1b   :  { %p1422_p11 = scmp.ne.s32.totalorder %s30_s30, %s1421_s12  ;;  %p1427_p13 = scmp.lt.s32.totalorder %s1421_s12, %s1421_s12 }
  0x1d   :  { %p1428_p0 = por %p1427_p13, %p1426_p12 }
  0x1f   :  { %p1429_p1 = pnand %p1428_p0, %p1422_p11 }
  0x21   :  { %1432 = shalt.err (!%p1429_p1)
}
  0x22   :  { %s1465_s0 = smov 192   ;;  %s1466_s13 = smov 12  }
  0x23   :  { %35 = dma.hbm_to_vmem [thread:$0]  %s1646_s1, 6144, %s30_s30, [#allocation7], %s1465_s0, %s1465_s0, %s1466_s13  }
  0x24   :  { %1455 = dma.done.wait [#allocation4], 2048  }
  0x25   :  { %1456 = vsyncadd [#allocation4], 4294965248 }
  0x26   :  { %1457 = dma.done.wait [#allocation7], 6144  }
  0x27   :  { %1458 = vsyncadd [#allocation7], 4294961152  ;;  %v1301_v0 = vld [vmem:[#allocation6 + $0x4] ss:$12 sps:$4 sm:$0xff]   ;;  %v1303_v1 = vld [vmem:[#allocation6] ss:$12 sps:$4 sm:$0xff]  }
  0x28   :  { %563 = vmatprep.subr.bf16.mxu0 %v1301_v0  ;;  %v1304_v2 = vld [vmem:[#allocation6 + $0x1c] ss:$12 sps:$4 sm:$0xff]   ;;  %v1306_v3 = vld [vmem:[#allocation6 + $0x18] ss:$12 sps:$4 sm:$0xff]   ;;  %v1307_v4 = vld [vmem:[#allocation6 + $0x34] ss:$12 sps:$4 sm:$0xff]   ;;  %v922_v0 = vlaneseq }
  0x29   :  { %564 = vmatpush1.bf16.msra.mxu0 %v1303_v1  ;;  %v1309_v5 = vld [vmem:[#allocation6 + $0x30] ss:$12 sps:$4 sm:$0xff]   ;;  %v1310_v6 = vld [vmem:[#allocation6 + $0x4c] ss:$12 sps:$4 sm:$0xff]   ;;  %v1322_v7 = vld [vmem:[#allocation6 + $0xc8] ss:$12 sps:$4 sm:$0xff]  }
  0x2a   :  { %565 = vmatprep.subr.bf16.mxu0 %v1304_v2  ;;  %v1312_v8 = vld [vmem:[#allocation6 + $0x48] ss:$12 sps:$4 sm:$0xff]   ;;  %v1313_v9 = vld [vmem:[#allocation6 + $0x64] ss:$12 sps:$4 sm:$0xff]   ;;  %1228 = vmatprep.subr.bf16.mxu1 %v1322_v7  ;;  %v1327_v11 = vld [vmem:[#allocation6 + $0xe0] ss:$12 sps:$4 sm:$0xff]  }
  0x2b   :  { %v1325_v10 = vld [vmem:[#allocation6 + $0x8] ss:$12 sps:$4 sm:$0xff]   ;;  %v1315_v12 = vld [vmem:[#allocation6 + $0x60] ss:$12 sps:$4 sm:$0xff]   ;;  %v1332_v15 = vld [vmem:[#allocation6 + $0xf8] ss:$12 sps:$4 sm:$0xff]  }
  0x2c   :  { %1229 = vmatpush3.bf16.msra.mxu1 %v1325_v10  ;;  %v1316_v13 = vld [vmem:[#allocation6 + $0x7c] ss:$12 sps:$4 sm:$0xff]   ;;  %v1330_v14 = vld [vmem:[#allocation6 + $0x20] ss:$12 sps:$4 sm:$0xff]   ;;  %v1318_v16 = vld [vmem:[#allocation6 + $0x78] ss:$12 sps:$4 sm:$0xff]  }
  0x2d   :  { %566 = vmatpush1.bf16.msra.mxu0 %v1306_v3  ;;  %1230 = vmatprep.subr.bf16.mxu1 %v1327_v11  ;;  %v1335_v17 = vld [vmem:[#allocation6 + $0x38] ss:$12 sps:$4 sm:$0xff]   ;;  %v1319_v18 = vld [vmem:[#allocation6 + $0x94] ss:$12 sps:$4 sm:$0xff]   ;;  %v1337_v19 = vld [vmem:[#allocation6 + $0x110] ss:$12 sps:$4 sm:$0xff]  }
  0x2e   :  { %567 = vmatprep.subr.bf16.mxu0 %v1307_v4  ;;  %v1321_v20 = vld [vmem:[#allocation6 + $0x90] ss:$12 sps:$4 sm:$0xff]   ;;  %v1342_v22 = vld [vmem:[#allocation6 + $0x128] ss:$12 sps:$4 sm:$0xff]   ;;  %v1323_v23 = vld [vmem:[#allocation6 + $0xac] ss:$12 sps:$4 sm:$0xff]  }
  0x2f   :  { %v1340_v21 = vld [vmem:[#allocation6 + $0x50] ss:$12 sps:$4 sm:$0xff]   ;;  %v1326_v24 = vld [vmem:[#allocation6 + $0xa8] ss:$12 sps:$4 sm:$0xff]   ;;  %v1347_v26 = vld [vmem:[#allocation6 + $0x140] ss:$12 sps:$4 sm:$0xff]  }
  0x30   :  { %1231 = vmatpush3.bf16.msra.mxu1 %v1330_v14  ;;  %v1345_v25 = vld [vmem:[#allocation6 + $0x68] ss:$12 sps:$4 sm:$0xff]   ;;  %v1328_v27 = vld [vmem:[#allocation6 + $0xc4] ss:$12 sps:$4 sm:$0xff]   ;;  %v1331_v28 = vld [vmem:[#allocation6 + $0xc0] ss:$12 sps:$4 sm:$0xff]  }
  0x31   :  { %568 = vmatpush1.bf16.msra.mxu0 %v1309_v5  ;;  %1232 = vmatprep.subr.bf16.mxu1 %v1332_v15  ;;  %v1350_v29 = vld [vmem:[#allocation6 + $0x80] ss:$12 sps:$4 sm:$0xff]   ;;  %v1352_v30 = vld [vmem:[#allocation6 + $0x158] ss:$12 sps:$4 sm:$0xff]   ;;  %v1333_v31 = vld [vmem:[#allocation6 + $0xdc] ss:$12 sps:$4 sm:$0xff]  }
  0x32   :  { %569 = vmatprep.subr.bf16.mxu0 %v1310_v6  ;;  %v1355_v32 = vld [vmem:[#allocation6 + $0x98] ss:$12 sps:$4 sm:$0xff]   ;;  %v1357_v34 = vld [vmem:[#allocation6 + $0x170] ss:$12 sps:$4 sm:$0xff]   ;;  %v1338_v35 = vld [vmem:[#allocation6 + $0xf4] ss:$12 sps:$4 sm:$0xff]  }
  0x33   :  { %v1336_v33 = vld [vmem:[#allocation6 + $0xd8] ss:$12 sps:$4 sm:$0xff]   ;;  %v1360_v37 = vld [vmem:[#allocation6 + $0xb0] ss:$12 sps:$4 sm:$0xff]   ;;  %v1362_v40 = vld [vmem:[#allocation3] ss:$8 sps:$4 sm:$0xff]  }
  0x34   :  { %1233 = vmatpush3.bf16.msra.mxu1 %v1335_v17  ;;  %v1364_v36 = vld [vmem:[#allocation3 + $0x4] ss:$8 sps:$4 sm:$0xff]   ;;  %v1341_v38 = vld [vmem:[#allocation6 + $0xf0] ss:$12 sps:$4 sm:$0xff]   ;;  %v1346_v42 = vld [vmem:[#allocation6 + $0x108] ss:$12 sps:$4 sm:$0xff]  }
  0x35   :  { %570 = vmatpush1.bf16.msra.mxu0 %v1312_v8  ;;  %1234 = vmatprep.subr.bf16.mxu1 %v1337_v19  ;;  %v1343_v39 = vld [vmem:[#allocation6 + $0x10c] ss:$12 sps:$4 sm:$0xff]   ;;  %v1368_v41 = vld [vmem:[#allocation3 + $0x14] ss:$8 sps:$4 sm:$0xff]   ;;  %v1348_v43 = vld [vmem:[#allocation6 + $0x124] ss:$12 sps:$4 sm:$0xff]  }
  0x36   :  { %571 = vmatprep.subr.bf16.mxu0 %v1313_v9  ;;  %708 = vmatprep.mubr.bf16.mxu1 %v1364_v36  ;;  %v1351_v44 = vld [vmem:[#allocation6 + $0x120] ss:$12 sps:$4 sm:$0xff]   ;;  %v1353_v45 = vld [vmem:[#allocation6 + $0x13c] ss:$12 sps:$4 sm:$0xff]   ;;  %v1370_v46 = vld [vmem:[#allocation3 + $0x10] ss:$8 sps:$4 sm:$0xff]  }
  0x37   :  { %595 = vmatprep.mubr.bf16.mxu0 %v1364_v36  ;;  %v1371_v47 = vld [vmem:[#allocation3 + $0x24] ss:$8 sps:$4 sm:$0xff]   ;;  %v1358_v49 = vld [vmem:[#allocation6 + $0x154] ss:$12 sps:$4 sm:$0xff]   ;;  %v1361_v50 = vld [vmem:[#allocation6 + $0x150] ss:$12 sps:$4 sm:$0xff]  }
  0x38   :  { %1235 = vmatpush3.bf16.msra.mxu1 %v1340_v21  ;;  %v1356_v48 = vld [vmem:[#allocation6 + $0x138] ss:$12 sps:$4 sm:$0xff]   ;;  %v1373_v52 = vld [vmem:[#allocation3 + $0x20] ss:$8 sps:$4 sm:$0xff]   ;;  %v1374_v53 = vld [vmem:[#allocation3 + $0x34] ss:$8 sps:$4 sm:$0xff]  }
  0x39   :  { %572 = vmatpush1.bf16.msra.mxu0 %v1315_v12  ;;  %1236 = vmatprep.subr.bf16.mxu1 %v1342_v22  ;;  %v1365_v51 = vld [vmem:[#allocation6 + $0x16c] ss:$12 sps:$4 sm:$0xff]   ;;  %v1367_v54 = vld [vmem:[#allocation6 + $0x168] ss:$12 sps:$4 sm:$0xff]   ;;  %v923_v1 = vshrl.u32 %v922_v0, 7 }
  0x3a   :  { %573 = vmatprep.subr.bf16.mxu0 %v1316_v13  ;;  %v1376_v55 = vld [vmem:[#allocation3 + $0x30] ss:$8 sps:$4 sm:$0xff]   ;;  %v1377_v56 = vld [vmem:[#allocation3 + $0x44] ss:$8 sps:$4 sm:$0xff]   ;;  %v1379_v57 = vld [vmem:[#allocation3 + $0x40] ss:$8 sps:$4 sm:$0xff]  }
  0x3b   :  { %v1380_v58 = vld [vmem:[#allocation3 + $0x54] ss:$8 sps:$4 sm:$0xff]   ;;  %v1382_v59 = vld [vmem:[#allocation3 + $0x50] ss:$8 sps:$4 sm:$0xff]   ;;  %v1383_v60 = vld [vmem:[#allocation3 + $0x64] ss:$8 sps:$4 sm:$0xff]  }
  0x3c   :  { %1237 = vmatpush3.bf16.msra.mxu1 %v1345_v25  ;;  %v1385_v61 = vld [vmem:[#allocation3 + $0x60] ss:$8 sps:$4 sm:$0xff]   ;;  %v1386_v62 = vld [vmem:[#allocation3 + $0x74] ss:$8 sps:$4 sm:$0xff]   ;;  %v1388_v63 = vld [vmem:[#allocation3 + $0x70] ss:$8 sps:$4 sm:$0xff]  }
  0x3d   :  { %574 = vmatpush1.bf16.msra.mxu0 %v1318_v16  ;;  %1238 = vmatprep.subr.bf16.mxu1 %v1347_v26  ;;  %v932_v2 = vsub.s32 2, %v923_v1  ;;  %v920_v3 = vld [vmem:[%s1647_s2] sm:$0x7]  ;;  %v924_v26 = vsub.s32 0, %v923_v1  ;;  %s1467_s2 = smov [#allocation8]  }
  0x3e   :  { %575 = vmatprep.subr.bf16.mxu0 %v1319_v18  ;;  %v985_v4 = vld [vmem:[%s1648_s3] sm:$0x7]  ;;  %s1151_s3 = sshll.u32 %s1467_s2, 4  ;;  %s1152_s3 = int_to_ptr.vmem [resolvable:$true] %s1151_s3 }
  0x3f   :  { %v1525_v6 = vrot.slane %v920_v3, %v932_v2  ;;  %v1527_v9 = vrot.slane %v985_v4, %v932_v2  ;;  %s1433_s19 = scalar_lea.vmem %s1152_s3, 6144  ;;  %p1438_p3 = scmp.lt.s32.totalorder %s1152_s3, %s1152_s3 }
  0x40   :  { %1239 = vmatpush3.bf16.msra.mxu1 %v1350_v29  ;;  %v928_v29 = vsub.s32 1, %v923_v1  ;;  %p1434_p2 = scmp.ne.s32.totalorder %s1152_s3, %s1433_s19  ;;  %p1439_p4 = scmp.lt.s32.totalorder %s1433_s19, %s1433_s19 }
  0x41   :  { %576 = vmatpush1.bf16.msra.mxu0 %v1321_v20  ;;  %1240 = vmatprep.subr.bf16.mxu1 %v1352_v30 }
  0x42   :  { %577 = vmatprep.subr.bf16.mxu0 %v1323_v23  ;;  %p1440_p5 = por %p1439_p4, %p1438_p3 }
  0x44   :  { %1241 = vmatpush3.bf16.msra.mxu1 %v1355_v32  ;;  %p1441_p6 = pnand %p1440_p5, %p1434_p2 }
  0x45   :  { %578 = vmatpush1.bf16.msra.mxu0 %v1326_v24  ;;  %1242 = vmatprep.subr.bf16.mxu1 %v1357_v34  ;;  %v1537_v34 = vrot.slane %v920_v3, %v924_v26 }
  0x46   :  { %579 = vmatprep.subr.bf16.mxu0 %v1328_v27 }
  0x48   :  { %1243 = vmatpush3.bf16.msra.mxu1 %v1360_v37 }
  0x49   :  { %580 = vmatpush1.bf16.msra.mxu0 %v1331_v28 }
  0x4a   :  { %581 = vmatprep.subr.bf16.mxu0 %v1333_v31 }
  0x4b   :  { %709 = vmatmul.mubr.bf16.vlgmr.msra.gmra.mrb[0].mxu1 %v1362_v40 }
  0x4c   :  { %716 = vmatprep.mubr.bf16.mxu1 %v1368_v41 }
  0x4d   :  { %582 = vmatpush1.bf16.msra.mxu0 %v1336_v33 }
  0x4e   :  { %583 = vmatprep.subr.bf16.mxu0 %v1338_v35 }
  0x51   :  { %584 = vmatpush1.bf16.msra.mxu0 %v1341_v38  ;;  %v1539_v38 = vrot.slane %v920_v3, %v928_v29 }
  0x52   :  { %585 = vmatprep.subr.bf16.mxu0 %v1343_v39 }
  0x53   :  { %717 = vmatmul.mubr.bf16.gmra.mrb[4].mxu1 %v1370_v46 }
  0x54   :  { %724 = vmatprep.mubr.bf16.mxu1 %v1371_v47 }
  0x55   :  { %586 = vmatpush1.bf16.msra.mxu0 %v1346_v42 }
  0x56   :  { %587 = vmatprep.subr.bf16.mxu0 %v1348_v43 }
  0x59   :  { %588 = vmatpush1.bf16.msra.mxu0 %v1351_v44  ;;  %v1544_v44 = vrot.slane %v985_v4, %v928_v29 }
  0x5a   :  { %589 = vmatprep.subr.bf16.mxu0 %v1353_v45 }
  0x5b   :  { %725 = vmatmul.mubr.bf16.gmra.mrb[8].mxu1 %v1373_v52 }
  0x5c   :  { %732 = vmatprep.mubr.bf16.mxu1 %v1374_v53 }
  0x5d   :  { %590 = vmatpush1.bf16.msra.mxu0 %v1356_v48 }
  0x5e   :  { %591 = vmatprep.subr.bf16.mxu0 %v1358_v49 }
  0x61   :  { %592 = vmatpush1.bf16.msra.mxu0 %v1361_v50 }
  0x62   :  { %593 = vmatprep.subr.bf16.mxu0 %v1365_v51 }
  0x63   :  { %733 = vmatmul.mubr.bf16.gmra.mrb[12].mxu1 %v1376_v55 }
  0x64   :  { %740 = vmatprep.mubr.bf16.mxu1 %v1377_v56 }
  0x65   :  { %594 = vmatpush1.bf16.msra.mxu0 %v1367_v54 }
  0x68   :  { %596 = vmatmul.mubr.bf16.vlgmr.msra.gmra.mrb[0].mxu0 %v1362_v40  ;;  %v1541_v40 = vrot.slane %v985_v4, %v924_v26 }
  0x69   :  { %605 = vmatprep.mubr.bf16.mxu0 %v1368_v41 }
  0x6b   :  { %741 = vmatmul.mubr.bf16.gmra.mrb[16].mxu1 %v1379_v57 }
  0x6c   :  { %748 = vmatprep.mubr.bf16.mxu1 %v1380_v58 }
  0x70   :  { %606 = vmatmul.mubr.bf16.gmra.mrb[4].mxu0 %v1370_v46 }
  0x71   :  { %615 = vmatprep.mubr.bf16.mxu0 %v1371_v47 }
  0x73   :  { %749 = vmatmul.mubr.bf16.gmra.mrb[20].mxu1 %v1382_v59 }
  0x74   :  { %756 = vmatprep.mubr.bf16.mxu1 %v1383_v60 }
  0x78   :  { %616 = vmatmul.mubr.bf16.gmra.mrb[8].mxu0 %v1373_v52 }
  0x79   :  { %625 = vmatprep.mubr.bf16.mxu0 %v1374_v53 }
  0x7b   :  { %757 = vmatmul.mubr.bf16.gmra.mrb[24].mxu1 %v1385_v61 }
  0x7c   :  { %764 = vmatprep.mubr.bf16.mxu1 %v1386_v62 }
  0x80   :  { %626 = vmatmul.mubr.bf16.gmra.mrb[12].mxu0 %v1376_v55 }
  0x81   :  { %635 = vmatprep.mubr.bf16.mxu0 %v1377_v56 }
  0x83   :  { %765 = vmatmul.mubr.bf16.gmra.mrb[28].mxu1 %v1388_v63 }
  0x88   :  { %636 = vmatmul.mubr.bf16.gmra.mrb[16].mxu0 %v1379_v57 }
  0x89   :  { %645 = vmatprep.mubr.bf16.mxu0 %v1380_v58 }
  0x90   :  { %646 = vmatmul.mubr.bf16.gmra.mrb[20].mxu0 %v1382_v59 }
  0x91   :  { %655 = vmatprep.mubr.bf16.mxu0 %v1383_v60 }
  0x98   :  { %656 = vmatmul.mubr.bf16.gmra.mrb[24].mxu0 %v1385_v61 }
  0x99   :  { %665 = vmatprep.mubr.bf16.mxu0 %v1386_v62 }
  0xa0   :  { %666 = vmatmul.mubr.bf16.gmra.mrb[28].mxu0 %v1388_v63 }
 0x11e   :  { %v1244_v5 = vpop.f32.mrb[0].mxu1 }
 0x11f   :  { %v1245_v7 = vpop.f32.mrb[1].mxu1 }
 0x120   :  { %v1246_v8 = vadd.f32 %v1245_v7, %v1244_v5  ;;  %v1247_v10 = vpop.f32.mrb[2].mxu1 }
 0x121   :  { %v1248_v11 = vpop.f32.mrb[3].mxu1 }
 0x122   :  { %v939_v12 = vmul.f32 %v1246_v8, %v1525_v6  ;;  %v1249_v13 = vadd.f32 %v1248_v11, %v1247_v10 }
 0x124   :  { %v1004_v14 = vadd.f32 %v1527_v9, %v939_v12  ;;  %v942_v15 = vmul.f32 %v1249_v13, %v1525_v6 }
 0x126   :  { %v1052_v16 = vmax.f32 %v1004_v14, 0.0  ;;  %v1007_v17 = vadd.f32 %v1527_v9, %v942_v15  ;;  %v1250_v18 = vpop.f32.mrb[4].mxu1 }
 0x127   :  { %v1251_v19 = vpop.f32.mrb[5].mxu1 }
 0x128   :  { %1100 = vst [vmem:[#allocation8 + $0x10] sm:$0xff] %v1052_v16  ;;  %v1055_v20 = vmax.f32 %v1007_v17, 0.0  ;;  %v1252_v21 = vadd.f32 %v1251_v19, %v1250_v18  ;;  %v1253_v22 = vpop.f32.mrb[6].mxu1 }
 0x129   :  { %v1254_v23 = vpop.f32.mrb[7].mxu1 }
 0x12a   :  { %1103 = vst [vmem:[#allocation8 + $0x28] sm:$0xff] %v1055_v20  ;;  %v945_v24 = vmul.f32 %v1252_v21, %v1525_v6  ;;  %v1255_v25 = vadd.f32 %v1254_v23, %v1253_v22 }
 0x12c   :  { %v1010_v27 = vadd.f32 %v1527_v9, %v945_v24  ;;  %v948_v28 = vmul.f32 %v1255_v25, %v1525_v6 }
 0x12e   :  { %v1058_v30 = vmax.f32 %v1010_v27, 0.0  ;;  %v1013_v31 = vadd.f32 %v1527_v9, %v948_v28  ;;  %v1256_v32 = vpop.f32.mrb[8].mxu1 }
 0x12f   :  { %v1257_v33 = vpop.f32.mrb[9].mxu1 }
 0x130   :  { %1106 = vst [vmem:[#allocation8 + $0x40] sm:$0xff] %v1058_v30  ;;  %v1061_v35 = vmax.f32 %v1013_v31, 0.0  ;;  %v1258_v36 = vadd.f32 %v1257_v33, %v1256_v32  ;;  %v1259_v37 = vpop.f32.mrb[10].mxu1 }
 0x131   :  { %v1260_v39 = vpop.f32.mrb[11].mxu1 }
 0x132   :  { %1109 = vst [vmem:[#allocation8 + $0x58] sm:$0xff] %v1061_v35  ;;  %v951_v41 = vmul.f32 %v1258_v36, %v1525_v6  ;;  %v1261_v42 = vadd.f32 %v1260_v39, %v1259_v37 }
 0x134   :  { %v1016_v47 = vadd.f32 %v1527_v9, %v951_v41  ;;  %v954_v48 = vmul.f32 %v1261_v42, %v1525_v6 }
 0x136   :  { %v1064_v54 = vmax.f32 %v1016_v47, 0.0  ;;  %v1019_v55 = vadd.f32 %v1527_v9, %v954_v48  ;;  %v1262_v56 = vpop.f32.mrb[12].mxu1 }
 0x137   :  { %v1263_v59 = vpop.f32.mrb[13].mxu1 }
 0x138   :  { %1112 = vst [vmem:[#allocation8 + $0x70] sm:$0xff] %v1064_v54  ;;  %v1067_v62 = vmax.f32 %v1019_v55, 0.0  ;;  %v1264_v63 = vadd.f32 %v1263_v59, %v1262_v56  ;;  %v1265_v0 = vpop.f32.mrb[14].mxu1 }
 0x139   :  { %v1266_v3 = vpop.f32.mrb[15].mxu1 }
 0x13a   :  { %1115 = vst [vmem:[#allocation8 + $0x88] sm:$0xff] %v1067_v62  ;;  %v957_v5 = vmul.f32 %v1264_v63, %v1525_v6  ;;  %v1267_v7 = vadd.f32 %v1266_v3, %v1265_v0 }
 0x13b   :  { %v597_v43 = vpop.f32.mrb[0].mxu0 }
 0x13c   :  { %v937_v45 = vmul.f32 %v1537_v34, %v597_v43  ;;  %v599_v46 = vpop.f32.mrb[1].mxu0  ;;  %v1022_v13 = vadd.f32 %v1527_v9, %v957_v5  ;;  %v960_v14 = vmul.f32 %v1267_v7, %v1525_v6 }
 0x13d   :  { %v938_v49 = vmul.f32 %v1539_v38, %v599_v46  ;;  %v601_v50 = vpop.f32.mrb[2].mxu0 }
 0x13e   :  { %v1002_v51 = vadd.f32 %v1541_v40, %v937_v45  ;;  %v940_v52 = vmul.f32 %v1537_v34, %v601_v50  ;;  %v603_v53 = vpop.f32.mrb[3].mxu0  ;;  %v1070_v20 = vmax.f32 %v1022_v13, 0.0  ;;  %v1025_v21 = vadd.f32 %v1527_v9, %v960_v14  ;;  %v1268_v22 = vpop.f32.mrb[16].mxu1 }
 0x13f   :  { %v1003_v57 = vadd.f32 %v1544_v44, %v938_v49  ;;  %v941_v58 = vmul.f32 %v1539_v38, %v603_v53  ;;  %v1269_v25 = vpop.f32.mrb[17].mxu1 }
 0x140   :  { %v1050_v60 = vmax.f32 %v1002_v51, 0.0  ;;  %v1005_v61 = vadd.f32 %v1541_v40, %v940_v52  ;;  %1118 = vst [vmem:[#allocation8 + $0xa0] sm:$0xff] %v1070_v20  ;;  %v1073_v28 = vmax.f32 %v1025_v21, 0.0  ;;  %v1270_v29 = vadd.f32 %v1269_v25, %v1268_v22  ;;  %v1271_v30 = vpop.f32.mrb[18].mxu1 }
 0x141   :  { %v1051_v1 = vmax.f32 %v1003_v57, 0.0  ;;  %v1006_v2 = vadd.f32 %v1544_v44, %v941_v58  ;;  %v1272_v33 = vpop.f32.mrb[19].mxu1 }
 0x142   :  { %1098 = vst [vmem:[#allocation8] sm:$0xff] %v1050_v60  ;;  %v1053_v4 = vmax.f32 %v1005_v61, 0.0  ;;  %1121 = vst [vmem:[#allocation8 + $0xb8] sm:$0xff] %v1073_v28  ;;  %v963_v36 = vmul.f32 %v1270_v29, %v1525_v6  ;;  %v1273_v37 = vadd.f32 %v1272_v33, %v1271_v30 }
 0x143   :  { %1099 = vst [vmem:[#allocation8 + $0x8] sm:$0xff] %v1051_v1  ;;  %v1054_v8 = vmax.f32 %v1006_v2, 0.0  ;;  %v607_v10 = vpop.f32.mrb[4].mxu0 }
 0x144   :  { %1101 = vst [vmem:[#allocation8 + $0x18] sm:$0xff] %v1053_v4  ;;  %v943_v11 = vmul.f32 %v1537_v34, %v607_v10  ;;  %v609_v12 = vpop.f32.mrb[5].mxu0  ;;  %v1028_v45 = vadd.f32 %v1527_v9, %v963_v36  ;;  %v966_v46 = vmul.f32 %v1273_v37, %v1525_v6 }
 0x145   :  { %1102 = vst [vmem:[#allocation8 + $0x20] sm:$0xff] %v1054_v8  ;;  %v944_v15 = vmul.f32 %v1539_v38, %v609_v12  ;;  %v611_v16 = vpop.f32.mrb[6].mxu0 }
 0x146   :  { %v1008_v17 = vadd.f32 %v1541_v40, %v943_v11  ;;  %v946_v18 = vmul.f32 %v1537_v34, %v611_v16  ;;  %v613_v19 = vpop.f32.mrb[7].mxu0  ;;  %v1076_v52 = vmax.f32 %v1028_v45, 0.0  ;;  %v1031_v53 = vadd.f32 %v1527_v9, %v966_v46  ;;  %v1274_v54 = vpop.f32.mrb[20].mxu1 }
 0x147   :  { %v1009_v23 = vadd.f32 %v1544_v44, %v944_v15  ;;  %v947_v24 = vmul.f32 %v1539_v38, %v613_v19  ;;  %v1275_v57 = vpop.f32.mrb[21].mxu1 }
 0x148   :  { %v1056_v26 = vmax.f32 %v1008_v17, 0.0  ;;  %v1011_v27 = vadd.f32 %v1541_v40, %v946_v18  ;;  %1124 = vst [vmem:[#allocation8 + $0xd0] sm:$0xff] %v1076_v52  ;;  %v1079_v60 = vmax.f32 %v1031_v53, 0.0  ;;  %v1276_v61 = vadd.f32 %v1275_v57, %v1274_v54  ;;  %v1277_v62 = vpop.f32.mrb[22].mxu1 }
 0x149   :  { %v1057_v31 = vmax.f32 %v1009_v23, 0.0  ;;  %v1012_v32 = vadd.f32 %v1544_v44, %v947_v24  ;;  %v1278_v1 = vpop.f32.mrb[23].mxu1 }
 0x14a   :  { %1104 = vst [vmem:[#allocation8 + $0x30] sm:$0xff] %v1056_v26  ;;  %v1059_v35 = vmax.f32 %v1011_v27, 0.0  ;;  %1127 = vst [vmem:[#allocation8 + $0xe8] sm:$0xff] %v1079_v60  ;;  %v969_v3 = vmul.f32 %v1276_v61, %v1525_v6  ;;  %v1279_v4 = vadd.f32 %v1278_v1, %v1277_v62 }
 0x14b   :  { %1105 = vst [vmem:[#allocation8 + $0x38] sm:$0xff] %v1057_v31  ;;  %v1060_v39 = vmax.f32 %v1012_v32, 0.0  ;;  %v617_v41 = vpop.f32.mrb[8].mxu0 }
 0x14c   :  { %1107 = vst [vmem:[#allocation8 + $0x48] sm:$0xff] %v1059_v35  ;;  %v949_v42 = vmul.f32 %v1537_v34, %v617_v41  ;;  %v619_v43 = vpop.f32.mrb[9].mxu0  ;;  %v1034_v11 = vadd.f32 %v1527_v9, %v969_v3  ;;  %v972_v12 = vmul.f32 %v1279_v4, %v1525_v6 }
 0x14d   :  { %1108 = vst [vmem:[#allocation8 + $0x50] sm:$0xff] %v1060_v39  ;;  %v950_v47 = vmul.f32 %v1539_v38, %v619_v43  ;;  %v621_v48 = vpop.f32.mrb[10].mxu0 }
 0x14e   :  { %v1014_v49 = vadd.f32 %v1541_v40, %v949_v42  ;;  %v952_v50 = vmul.f32 %v1537_v34, %v621_v48  ;;  %v623_v51 = vpop.f32.mrb[11].mxu0  ;;  %v1082_v18 = vmax.f32 %v1034_v11, 0.0  ;;  %v1037_v19 = vadd.f32 %v1527_v9, %v972_v12  ;;  %v1280_v20 = vpop.f32.mrb[24].mxu1 }
 0x14f   :  { %v1015_v55 = vadd.f32 %v1544_v44, %v950_v47  ;;  %v953_v56 = vmul.f32 %v1539_v38, %v623_v51  ;;  %v1281_v23 = vpop.f32.mrb[25].mxu1 }
 0x150   :  { %v1062_v58 = vmax.f32 %v1014_v49, 0.0  ;;  %v1017_v59 = vadd.f32 %v1541_v40, %v952_v50  ;;  %1130 = vst [vmem:[#allocation8 + $0x100] sm:$0xff] %v1082_v18  ;;  %v1085_v26 = vmax.f32 %v1037_v19, 0.0  ;;  %v1282_v27 = vadd.f32 %v1281_v23, %v1280_v20  ;;  %v1283_v28 = vpop.f32.mrb[26].mxu1 }
 0x151   :  { %v1063_v63 = vmax.f32 %v1015_v55, 0.0  ;;  %v1018_v0 = vadd.f32 %v1544_v44, %v953_v56  ;;  %v1284_v31 = vpop.f32.mrb[27].mxu1 }
 0x152   :  { %1110 = vst [vmem:[#allocation8 + $0x60] sm:$0xff] %v1062_v58  ;;  %v1065_v2 = vmax.f32 %v1017_v59, 0.0  ;;  %1133 = vst [vmem:[#allocation8 + $0x118] sm:$0xff] %v1085_v26  ;;  %v975_v33 = vmul.f32 %v1282_v27, %v1525_v6  ;;  %v1285_v35 = vadd.f32 %v1284_v31, %v1283_v28 }
 0x153   :  { %1111 = vst [vmem:[#allocation8 + $0x68] sm:$0xff] %v1063_v63  ;;  %v1066_v5 = vmax.f32 %v1018_v0, 0.0  ;;  %v627_v7 = vpop.f32.mrb[12].mxu0 }
 0x154   :  { %1113 = vst [vmem:[#allocation8 + $0x78] sm:$0xff] %v1065_v2  ;;  %v955_v8 = vmul.f32 %v1537_v34, %v627_v7  ;;  %v629_v10 = vpop.f32.mrb[13].mxu0  ;;  %v1040_v42 = vadd.f32 %v1527_v9, %v975_v33  ;;  %v978_v43 = vmul.f32 %v1285_v35, %v1525_v6 }
 0x155   :  { %1114 = vst [vmem:[#allocation8 + $0x80] sm:$0xff] %v1066_v5  ;;  %v956_v13 = vmul.f32 %v1539_v38, %v629_v10  ;;  %v631_v14 = vpop.f32.mrb[14].mxu0 }
 0x156   :  { %v1020_v15 = vadd.f32 %v1541_v40, %v955_v8  ;;  %v958_v16 = vmul.f32 %v1537_v34, %v631_v14  ;;  %v633_v17 = vpop.f32.mrb[15].mxu0  ;;  %v1088_v50 = vmax.f32 %v1040_v42, 0.0  ;;  %v1043_v51 = vadd.f32 %v1527_v9, %v978_v43  ;;  %v1286_v52 = vpop.f32.mrb[28].mxu1 }
 0x157   :  { %v1021_v21 = vadd.f32 %v1544_v44, %v956_v13  ;;  %v959_v22 = vmul.f32 %v1539_v38, %v633_v17  ;;  %v1287_v55 = vpop.f32.mrb[29].mxu1 }
 0x158   :  { %v1068_v24 = vmax.f32 %v1020_v15, 0.0  ;;  %v1023_v25 = vadd.f32 %v1541_v40, %v958_v16  ;;  %1136 = vst [vmem:[#allocation8 + $0x130] sm:$0xff] %v1088_v50  ;;  %v1091_v58 = vmax.f32 %v1043_v51, 0.0  ;;  %v1288_v59 = vadd.f32 %v1287_v55, %v1286_v52  ;;  %v1289_v60 = vpop.f32.mrb[30].mxu1 }
 0x159   :  { %v1069_v29 = vmax.f32 %v1021_v21, 0.0  ;;  %v1024_v30 = vadd.f32 %v1544_v44, %v959_v22  ;;  %v1290_v63 = vpop.f32.mrb[31].mxu1 }
 0x15a   :  { %1116 = vst [vmem:[#allocation8 + $0x90] sm:$0xff] %v1068_v24  ;;  %v1071_v32 = vmax.f32 %v1023_v25, 0.0  ;;  %1139 = vst [vmem:[#allocation8 + $0x148] sm:$0xff] %v1091_v58  ;;  %v981_v1 = vmul.f32 %v1288_v59, %v1525_v6  ;;  %v1291_v2 = vadd.f32 %v1290_v63, %v1289_v60 }
 0x15b   :  { %1117 = vst [vmem:[#allocation8 + $0x98] sm:$0xff] %v1069_v29  ;;  %v1072_v36 = vmax.f32 %v1024_v30, 0.0  ;;  %v637_v37 = vpop.f32.mrb[16].mxu0 }
 0x15c   :  { %1119 = vst [vmem:[#allocation8 + $0xa8] sm:$0xff] %v1071_v32  ;;  %v961_v39 = vmul.f32 %v1537_v34, %v637_v37  ;;  %v639_v41 = vpop.f32.mrb[17].mxu0  ;;  %v1046_v8 = vadd.f32 %v1527_v9, %v981_v1  ;;  %v984_v10 = vmul.f32 %v1291_v2, %v1525_v6 }
 0x15d   :  { %1120 = vst [vmem:[#allocation8 + $0xb0] sm:$0xff] %v1072_v36  ;;  %v962_v45 = vmul.f32 %v1539_v38, %v639_v41  ;;  %v641_v46 = vpop.f32.mrb[18].mxu0 }
 0x15e   :  { %v1026_v47 = vadd.f32 %v1541_v40, %v961_v39  ;;  %v964_v48 = vmul.f32 %v1537_v34, %v641_v46  ;;  %v643_v49 = vpop.f32.mrb[19].mxu0  ;;  %v1094_v16 = vmax.f32 %v1046_v8, 0.0  ;;  %v1049_v17 = vadd.f32 %v1527_v9, %v984_v10 }
 0x15f   :  { %v1027_v53 = vadd.f32 %v1544_v44, %v962_v45  ;;  %v965_v54 = vmul.f32 %v1539_v38, %v643_v49 }
 0x160   :  { %v1074_v56 = vmax.f32 %v1026_v47, 0.0  ;;  %v1029_v57 = vadd.f32 %v1541_v40, %v964_v48  ;;  %1142 = vst [vmem:[#allocation8 + $0x160] sm:$0xff] %v1094_v16  ;;  %v1097_v6 = vmax.f32 %v1049_v17, 0.0 }
 0x161   :  { %v1075_v61 = vmax.f32 %v1027_v53, 0.0  ;;  %v1030_v62 = vadd.f32 %v1544_v44, %v965_v54 }
 0x162   :  { %1122 = vst [vmem:[#allocation8 + $0xc0] sm:$0xff] %v1074_v56  ;;  %v1077_v0 = vmax.f32 %v1029_v57, 0.0  ;;  %1145 = vst [vmem:[#allocation8 + $0x178] sm:$0xff] %v1097_v6 }
 0x163   :  { %1123 = vst [vmem:[#allocation8 + $0xc8] sm:$0xff] %v1075_v61  ;;  %v1078_v3 = vmax.f32 %v1030_v62, 0.0  ;;  %v647_v4 = vpop.f32.mrb[20].mxu0 }
 0x164   :  { %1125 = vst [vmem:[#allocation8 + $0xd8] sm:$0xff] %v1077_v0  ;;  %v967_v5 = vmul.f32 %v1537_v34, %v647_v4  ;;  %v649_v7 = vpop.f32.mrb[21].mxu0 }
 0x165   :  { %1126 = vst [vmem:[#allocation8 + $0xe0] sm:$0xff] %v1078_v3  ;;  %v968_v11 = vmul.f32 %v1539_v38, %v649_v7  ;;  %v651_v12 = vpop.f32.mrb[22].mxu0 }
 0x166   :  { %v1032_v13 = vadd.f32 %v1541_v40, %v967_v5  ;;  %v970_v14 = vmul.f32 %v1537_v34, %v651_v12  ;;  %v653_v15 = vpop.f32.mrb[23].mxu0 }
 0x167   :  { %v1033_v18 = vadd.f32 %v1544_v44, %v968_v11  ;;  %v971_v19 = vmul.f32 %v1539_v38, %v653_v15 }
 0x168   :  { %v1080_v20 = vmax.f32 %v1032_v13, 0.0  ;;  %v1035_v21 = vadd.f32 %v1541_v40, %v970_v14 }
 0x169   :  { %v1081_v22 = vmax.f32 %v1033_v18, 0.0  ;;  %v1036_v23 = vadd.f32 %v1544_v44, %v971_v19 }
 0x16a   :  { %1128 = vst [vmem:[#allocation8 + $0xf0] sm:$0xff] %v1080_v20  ;;  %v1083_v24 = vmax.f32 %v1035_v21, 0.0 }
 0x16b   :  { %1129 = vst [vmem:[#allocation8 + $0xf8] sm:$0xff] %v1081_v22  ;;  %v1084_v25 = vmax.f32 %v1036_v23, 0.0  ;;  %v657_v26 = vpop.f32.mrb[24].mxu0 }
 0x16c   :  { %1131 = vst [vmem:[#allocation8 + $0x108] sm:$0xff] %v1083_v24  ;;  %v973_v9 = vmul.f32 %v1537_v34, %v657_v26  ;;  %v659_v27 = vpop.f32.mrb[25].mxu0 }
 0x16d   :  { %1132 = vst [vmem:[#allocation8 + $0x110] sm:$0xff] %v1084_v25  ;;  %v974_v28 = vmul.f32 %v1539_v38, %v659_v27  ;;  %v661_v29 = vpop.f32.mrb[26].mxu0 }
 0x16e   :  { %v1038_v30 = vadd.f32 %v1541_v40, %v973_v9  ;;  %v976_v31 = vmul.f32 %v1537_v34, %v661_v29  ;;  %v663_v32 = vpop.f32.mrb[27].mxu0 }
 0x16f   :  { %v1039_v33 = vadd.f32 %v1544_v44, %v974_v28  ;;  %v977_v35 = vmul.f32 %v1539_v38, %v663_v32 }
 0x170   :  { %v1086_v36 = vmax.f32 %v1038_v30, 0.0  ;;  %v1041_v37 = vadd.f32 %v1541_v40, %v976_v31 }
 0x171   :  { %v1087_v39 = vmax.f32 %v1039_v33, 0.0  ;;  %v1042_v41 = vadd.f32 %v1544_v44, %v977_v35 }
 0x172   :  { %1134 = vst [vmem:[#allocation8 + $0x120] sm:$0xff] %v1086_v36  ;;  %v1089_v42 = vmax.f32 %v1041_v37, 0.0 }
 0x173   :  { %1135 = vst [vmem:[#allocation8 + $0x128] sm:$0xff] %v1087_v39  ;;  %v1090_v43 = vmax.f32 %v1042_v41, 0.0  ;;  %v667_v45 = vpop.f32.mrb[28].mxu0 }
 0x174   :  { %1137 = vst [vmem:[#allocation8 + $0x138] sm:$0xff] %v1089_v42  ;;  %v979_v46 = vmul.f32 %v1537_v34, %v667_v45  ;;  %v669_v47 = vpop.f32.mrb[29].mxu0 }
 0x175   :  { %1138 = vst [vmem:[#allocation8 + $0x140] sm:$0xff] %v1090_v43  ;;  %v980_v48 = vmul.f32 %v1539_v38, %v669_v47  ;;  %v671_v49 = vpop.f32.mrb[30].mxu0 }
 0x176   :  { %v1044_v50 = vadd.f32 %v1541_v40, %v979_v46  ;;  %v982_v51 = vmul.f32 %v1537_v34, %v671_v49  ;;  %v673_v52 = vpop.f32.mrb[31].mxu0 }
 0x177   :  { %v1045_v53 = vadd.f32 %v1544_v44, %v980_v48  ;;  %v983_v54 = vmul.f32 %v1539_v38, %v673_v52 }
 0x178   :  { %v1092_v55 = vmax.f32 %v1044_v50, 0.0  ;;  %v1047_v56 = vadd.f32 %v1541_v40, %v982_v51 }
 0x179   :  { %v1093_v57 = vmax.f32 %v1045_v53, 0.0  ;;  %v1048_v58 = vadd.f32 %v1544_v44, %v983_v54 }
 0x17a   :  { %1140 = vst [vmem:[#allocation8 + $0x150] sm:$0xff] %v1092_v55  ;;  %v1095_v59 = vmax.f32 %v1047_v56, 0.0 }
 0x17b   :  { %1141 = vst [vmem:[#allocation8 + $0x158] sm:$0xff] %v1093_v57  ;;  %v1096_v60 = vmax.f32 %v1048_v58, 0.0 }
 0x17c   :  { %1143 = vst [vmem:[#allocation8 + $0x168] sm:$0xff] %v1095_v59 }
 0x17d   :  { %1144 = vst [vmem:[#allocation8 + $0x170] sm:$0xff] %v1096_v60 }
 0x17e   :  { %1444 = shalt.err (!%p1441_p6)
}
 0x17f   :  { %s1445_s22 = scalar_lea.hbm %s1649_s4, 6144 }
 0x180   :  { %p1446_p7 = scmp.ne.s32.totalorder %s1649_s4, %s1445_s22  ;;  %p1449_p8 = scmp.lt.u32.totalorder %s1445_s22, %s1649_s4 }
 0x182   :  { %p1451_p9 = pnand %p1449_p8, %p1446_p7 }
 0x184   :  { %1454 = shalt.err (!%p1451_p9)
}
 0x185   :  { %s1468_s27 = smov 384   ;;  %s1469_s28 = smov 24  }
 0x186   :  { %1157 = dma.vmem_to_hbm [thread:$0]  %s1152_s3, 6144, %s1649_s4, [#allocation5], %s1468_s27, %s1468_s27, %s1469_s28  }
 0x187   :  { %1459 = dma.done.wait [#allocation5], 6144  }
 0x188   :  { %1460 = vsyncadd [#allocation5], 4294961152 }
 0x189   :  { %1161 = vsyncpa [#allocation4], 1 }
 0x18a   :  { %1162 = vsyncpa [#allocation7], 1 }
 0x18b   :  { %1163 = vsyncpa [#allocation5], 1 }

</bundles_post_ra>
